<compile_context>
chip_gen: v7x
topology: tpu7x:2x2x1
jax: 0.10.0
libtpu: 0.0.40
codegen_flags: <defaults>
</compile_context>

<pallas_src>
import functools

import jax
import jax.numpy as jnp
from jax.experimental import pallas as pl
from jax.experimental.pallas import tpu as pltpu


def _leaky_relu(v, slope=0.01):
    return jnp.where(v > 0, v, slope * v)


def _round_up8(n):
    return ((n + 7) // 8) * 8


def _hadamard_attention_kernel(x_ref, wh1_ref, wh2_ref, mlp_ref, wmask_ref, out_ref,
                               *, shifts, inv_hw_x2, n_ch, mlp_offsets):
    f32 = jnp.float32
    r_w1, r_b1, r_w2, r_b2 = mlp_offsets
    bb = x_ref.shape[0]                                 # batch_block (static)

    x = x_ref[...].astype(f32)                          # (Bb, C, HW)
    wh1 = wh1_ref[...]                                  # (C, HW), already f32
    wh2 = wh2_ref[...]                                  # (C, HW), already f32
    w1t = mlp_ref[r_w1:r_w1 + n_ch, :]                  # (C, Cr)  == W1^T
    b1r = mlp_ref[r_b1:r_b1 + 1, :]                     # (1, Cr)
    w2m = mlp_ref[r_w2:r_w2 + n_ch, :]                  # (C, Cr)
    b2c = mlp_ref[r_b2:r_b2 + n_ch, 0:1]                # (C, 1)

    # ---------------- ChannelAttentionHadamard ----------------
    xt1 = _leaky_relu(x * wh1[None])                                        # (Bb, C, HW)
    # avg-pool(1) + "max"-pool(1) (BOTH AdaptiveAvgPool2d) -> 2 * mean over H*W
    pooled = jnp.sum(xt1, axis=2, keepdims=True) * inv_hw_x2                # (Bb, C, 1)
    # tiny channel MLP on the VPU (exact f32): h = relu(pooled @ W1^T + b1)
    h = jnp.maximum(
        jnp.sum(pooled * w1t[None], axis=1, keepdims=True) + b1r[None], 0.0)  # (Bb, 1, Cr)
    att_c = jax.nn.sigmoid(
        jnp.sum(h * w2m[None], axis=2, keepdims=True) + b2c[None])            # (Bb, C, 1)
    x1 = x * att_c                                                             # (Bb, C, HW)

    # ---------------- SpatialAttentionHadamard ----------------
    xt2 = _leaky_relu(x1 * wh2[None])                                          # (Bb, C, HW)
    # conv input ch 0 = channel-mean, ch 1 = channel-max, stacked into one lane-dense
    # (2*Bb, HW) 2-D map so each roll / FMA covers the whole batch block.
    m2 = jnp.concatenate([jnp.mean(xt2, axis=1), jnp.max(xt2, axis=1)], axis=0)  # (2Bb, HW)

    # 'same'-padded (KH, KW) conv on the flattened map:
    #   out[p] = sum_t m[(p + s_t) mod HW] * w_t * valid_t[p]
    # -> one lane roll (XLU) + one FMA (VPU) per tap; weight*boundary-mask precomputed host-side.
    acc = jnp.zeros_like(m2)
    for t, shift in enumerate(shifts):
        rolled = m2 if shift == 0 else pltpu.roll(m2, shift, axis=1)
        acc = acc + rolled * wmask_ref[t]                                     # (2Bb, HW)
    conv = acc[0:bb, :] + acc[bb:2 * bb, :]                                   # (Bb, HW)
    att_s = jax.nn.sigmoid(conv)[:, None, :]                                  # (Bb, 1, HW)

    out_ref[...] = (x1 * att_s).astype(out_ref.dtype)


def _pick_batch_block(batch, n_ch, hw, itemsize):
    # Keep the double-buffered (input + output) blocks well under v7x's 32 MiB scoped VMEM
    # default (64 MiB physical); v5e/v6e have 128 MiB so the same cap is safe there too.
    vmem_budget = 24 << 20
    per_item = 4 * n_ch * hw * itemsize              # 2 x input block + 2 x output block
    cap = max(1, vmem_budget // max(per_item, 1))
    # Modest block, and grid >= 2 whenever batch >= 2 (pipelining + v7x megacore).
    target = min(8, cap, batch if batch < 2 else max(1, batch // 2))
    for bb in range(int(target), 0, -1):
        if batch % bb == 0:
            return bb
    return 1


def hadamard_attention(x, params, spatial_kernel=(2, 2), batch_block=None):
    """params = (wh1, wh2, w1, b1, w2, b2, conv_w) with PyTorch-style shapes:
       wh1/wh2: (C, H, W); w1: (Cr, C); b1: (Cr, 1); w2: (C, Cr); b2: (C, 1);
       conv_w: (1, 2, KH, KW)."""
    B, C, H, W = x.shape
    HW = H * W
    KH, KW = spatial_kernel
    lh, lw = (KH - 1) // 2, (KW - 1) // 2             # PyTorch 'same' left/top pads
    wh1, wh2, w1, b1, w2, b2, conv_w = params
    Cr = w1.shape[0]
    f32 = jnp.float32

    if batch_block is None:
        batch_block = _pick_batch_block(B, C, HW, jnp.dtype(x.dtype).itemsize)
    assert B % batch_block == 0, "batch_block must divide the batch size"
    grid = (B // batch_block,)

    # Lane-dense activations: (B, C, H*W) with H*W a multiple of 128.
    x_flat = x.reshape(B, C, HW)
    wh1_flat = jnp.asarray(wh1, f32).reshape(C, HW)
    wh2_flat = jnp.asarray(wh2, f32).reshape(C, HW)

    # One packed MLP operand, 8-row-aligned sections: [W1^T ; b1 ; W2 ; b2 (lane-bcast)].
    r_w1 = 0
    r_b1 = _round_up8(C)
    r_w2 = r_b1 + 8
    r_b2 = r_w2 + _round_up8(C)
    mlp_rows = r_b2 + _round_up8(C)
    mlp_pack = jnp.zeros((mlp_rows, Cr), f32)
    mlp_pack = mlp_pack.at[r_w1:r_w1 + C, :].set(jnp.asarray(w1, f32).T)
    mlp_pack = mlp_pack.at[r_b1, :].set(jnp.asarray(b1, f32).reshape(Cr))
    mlp_pack = mlp_pack.at[r_w2:r_w2 + C, :].set(jnp.asarray(w2, f32))
    mlp_pack = mlp_pack.at[r_b2:r_b2 + C, :].set(
        jnp.broadcast_to(jnp.asarray(b2, f32).reshape(C, 1), (C, Cr)))

    # Per conv tap (i, j): lane-roll amount on the flattened (H*W) map, and the boundary
    # validity mask folded with the conv weight (static, host side).  Rows [0:bb] carry the
    # mean-channel weight, rows [bb:2bb] the max-channel weight, matching the stacked
    # (2*batch_block, HW) map inside the kernel.
    cw = jnp.asarray(conv_w, f32).reshape(2, KH, KW)
    pos = jnp.arange(HW)
    row, col = pos // W, pos % W
    shifts, masks = [], []
    for i in range(KH):
        for j in range(KW):
            di, dj = i - lh, j - lw
            shifts.append(int((-(di * W + dj)) % HW))
            valid = ((row + di >= 0) & (row + di < H) &
                     (col + dj >= 0) & (col + dj < W))
            masks.append(valid.astype(f32))
    n_taps = KH * KW
    mask_arr = jnp.stack(masks, axis=0)                                      # (n_taps, HW)
    w_mean = cw[0].reshape(n_taps, 1, 1) * mask_arr[:, None, :]              # (n_taps, 1, HW)
    w_max = cw[1].reshape(n_taps, 1, 1) * mask_arr[:, None, :]
    wmask = jnp.concatenate(
        [jnp.broadcast_to(w_mean, (n_taps, batch_block, HW)),
         jnp.broadcast_to(w_max, (n_taps, batch_block, HW))], axis=1)        # (n_taps, 2bb, HW)

    kernel = functools.partial(
        _hadamard_attention_kernel,
        shifts=tuple(shifts), inv_hw_x2=2.0 / HW, n_ch=C,
        mlp_offsets=(r_w1, r_b1, r_w2, r_b2))

    out_flat = pl.pallas_call(
        kernel,
        out_shape=jax.ShapeDtypeStruct((B, C, HW), x.dtype),
        grid_spec=pltpu.PrefetchScalarGridSpec(
            num_scalar_prefetch=0,
            grid=grid,
            in_specs=[
                pl.BlockSpec((batch_block, C, HW), lambda g: (g, 0, 0)),      # x (flattened)
                pl.BlockSpec((C, HW), lambda g: (0, 0)),                      # hadamard weight 1
                pl.BlockSpec((C, HW), lambda g: (0, 0)),                      # hadamard weight 2
                pl.BlockSpec((mlp_rows, Cr), lambda g: (0, 0)),               # packed MLP params
                pl.BlockSpec((n_taps, 2 * batch_block, HW),
                             lambda g: (0, 0, 0)),                            # conv weight*mask
            ],
            out_specs=pl.BlockSpec((batch_block, C, HW), lambda g: (g, 0, 0)),
        ),
        compiler_params=pltpu.CompilerParams(
            dimension_semantics=("parallel",)),
    )(x_flat, wh1_flat, wh2_flat, mlp_pack, wmask)
    return out_flat.reshape(B, C, H, W)


def reference(x, params, spatial_kernel=(2, 2)):
    """Plain-JAX reproduction of the PyTorch forward, for validation."""
    wh1, wh2, w1, b1, w2, b2, conv_w = params
    B, C, H, W = x.shape
    KH, KW = spatial_kernel
    lh, lw = (KH - 1) // 2, (KW - 1) // 2
    leaky = lambda v: jnp.where(v > 0, v, 0.01 * v)

    # channel attention
    xt = leaky(x * wh1[None])
    pooled = 2.0 * xt.mean(axis=(2, 3))                       # avg + (avg-as-max)
    h = jax.nn.relu(pooled @ w1.T + b1.reshape(-1))
    att = jax.nn.sigmoid(h @ w2.T + b2.reshape(-1))
    x1 = x * att[:, :, None, None]

    # spatial attention
    xt2 = leaky(x1 * wh2[None])
    stacked = jnp.stack([xt2.mean(axis=1), xt2.max(axis=1)], axis=1)  # (B,2,H,W)
    sp = jnp.pad(stacked, ((0, 0), (0, 0), (lh, KH - 1 - lh), (lw, KW - 1 - lw)))
    cw = conv_w.reshape(2, KH, KW)
    conv = jnp.zeros((B, H, W), jnp.float32)
    for c in range(2):
        for i in range(KH):
            for j in range(KW):
                conv = conv + sp[:, c, i:i + H, j:j + W] * cw[c, i, j]
    return x1 * jax.nn.sigmoid(conv)[:, None]


if __name__ == "__main__":
    B, C, H, W = 2, 8, 16, 16
    channel_ratio = 2.0
    Cr = int(C // channel_ratio)
    KH, KW = 2, 2

    key = jax.random.PRNGKey(0)
    keys = jax.random.split(key, 8)
    x = jax.random.normal(keys[0], (B, C, H, W), jnp.float32)
    wh1 = jax.random.normal(keys[1], (C, H, W), jnp.float32)
    wh2 = jax.random.normal(keys[2], (C, H, W), jnp.float32)
    w1 = jax.random.normal(keys[3], (Cr, C), jnp.float32) / jnp.sqrt(C)
    b1 = jax.random.normal(keys[4], (Cr, 1), jnp.float32) * 0.1
    w2 = jax.random.normal(keys[5], (C, Cr), jnp.float32) / jnp.sqrt(Cr)
    b2 = jax.random.normal(keys[6], (C, 1), jnp.float32) * 0.1
    conv_w = jax.random.normal(keys[7], (1, 2, KH, KW), jnp.float32) / jnp.sqrt(2 * KH * KW)
    params = (wh1, wh2, w1, b1, w2, b2, conv_w)

    out = hadamard_attention(x, params, (KH, KW))
    out = jax.block_until_ready(out)

    ref = reference(x, params, (KH, KW))
    assert out.shape == (B, C, H, W)
    assert jnp.allclose(out, ref, atol=5e-3, rtol=5e-3), \
        float(jnp.max(jnp.abs(out - ref)))

    print("KERNEL_OK")
</pallas_src>

<mosaic_0001>
module attributes {stable_mosaic.version = 11 : i64} {
  func.func @_hadamard_attention_kernel(%arg0: i32, %arg1: memref<1x8x256xf32, #tpu.memory_space<vmem>>, %arg2: memref<8x256xf32, #tpu.memory_space<vmem>>, %arg3: memref<8x256xf32, #tpu.memory_space<vmem>>, %arg4: memref<32x4xf32, #tpu.memory_space<vmem>>, %arg5: memref<4x2x256xf32, #tpu.memory_space<vmem>>, %arg6: memref<1x8x256xf32, #tpu.memory_space<vmem>>) attributes {dimension_semantics = [#tpu.dimension_semantics<parallel>], iteration_bounds = array<i64: 2>, scalar_prefetch = 0 : i64, scratch_operands = 0 : i64, tpu.core_type = #tpu.core_type<tc>, window_params = [{transform_indices = @transform_0, window_bounds = array<i64: 1, 8, 256>}, {pipeline_mode = #tpu.pipeline_mode<synchronous>, transform_indices = @transform_1, window_bounds = array<i64: 8, 256>}, {pipeline_mode = #tpu.pipeline_mode<synchronous>, transform_indices = @transform_2, window_bounds = array<i64: 8, 256>}, {pipeline_mode = #tpu.pipeline_mode<synchronous>, transform_indices = @transform_3, window_bounds = array<i64: 32, 4>}, {pipeline_mode = #tpu.pipeline_mode<synchronous>, transform_indices = @transform_4, window_bounds = array<i64: 4, 2, 256>}, {transform_indices = @transform_5, window_bounds = array<i64: 1, 8, 256>}]} {
    %c0 = arith.constant 0 : index
    %c0_0 = arith.constant 0 : index
    %c0_1 = arith.constant 0 : index
    %0 = vector.load %arg1[%c0, %c0_0, %c0_1] : memref<1x8x256xf32, #tpu.memory_space<vmem>>, vector<1x8x256xf32>
    %c0_2 = arith.constant 0 : index
    %c0_3 = arith.constant 0 : index
    %1 = vector.load %arg2[%c0_2, %c0_3] : memref<8x256xf32, #tpu.memory_space<vmem>>, vector<8x256xf32>
    %c0_4 = arith.constant 0 : index
    %c0_5 = arith.constant 0 : index
    %2 = vector.load %arg3[%c0_4, %c0_5] : memref<8x256xf32, #tpu.memory_space<vmem>>, vector<8x256xf32>
    %c0_6 = arith.constant 0 : index
    %c0_7 = arith.constant 0 : index
    %3 = vector.load %arg4[%c0_6, %c0_7] : memref<32x4xf32, #tpu.memory_space<vmem>>, vector<8x4xf32>
    %c8 = arith.constant 8 : index
    %c0_8 = arith.constant 0 : index
    %4 = vector.load %arg4[%c8, %c0_8] : memref<32x4xf32, #tpu.memory_space<vmem>>, vector<1x4xf32>
    %c16 = arith.constant 16 : index
    %c0_9 = arith.constant 0 : index
    %5 = vector.load %arg4[%c16, %c0_9] : memref<32x4xf32, #tpu.memory_space<vmem>>, vector<8x4xf32>
    %c24 = arith.constant 24 : index
    %c0_10 = arith.constant 0 : index
    %6 = vector.load %arg4[%c24, %c0_10] : memref<32x4xf32, #tpu.memory_space<vmem>>, vector<8x1xf32>
    %7 = vector.shape_cast %1 : vector<8x256xf32> to vector<1x8x256xf32>
    %8 = arith.mulf %0, %7 : vector<1x8x256xf32>
    %cst = arith.constant 0.000000e+00 : f32
    %9 = vector.broadcast %cst : f32 to vector<1x8x256xf32>
    %10 = arith.cmpf ogt, %8, %9 : vector<1x8x256xf32>
    %cst_11 = arith.constant 0.00999999977 : f32
    %11 = vector.broadcast %cst_11 : f32 to vector<1x8x256xf32>
    %12 = arith.mulf %11, %8 : vector<1x8x256xf32>
    %13 = arith.select %10, %8, %12 : vector<1x8x256xi1>, vector<1x8x256xf32>
    %cst_12 = arith.constant dense<0.000000e+00> : vector<1x8xf32>
    %14 = vector.multi_reduction <add>, %13, %cst_12 [2] : vector<1x8x256xf32> to vector<1x8xf32>
    %15 = vector.shape_cast %14 : vector<1x8xf32> to vector<1x8x1xf32>
    %cst_13 = arith.constant 7.812500e-03 : f32
    %16 = vector.broadcast %cst_13 : f32 to vector<1x8x1xf32>
    %17 = arith.mulf %15, %16 : vector<1x8x1xf32>
    %18 = vector.shape_cast %3 : vector<8x4xf32> to vector<1x8x4xf32>
    %19 = vector.broadcast %17 : vector<1x8x1xf32> to vector<1x8x4xf32>
    %20 = arith.mulf %19, %18 : vector<1x8x4xf32>
    %cst_14 = arith.constant dense<0.000000e+00> : vector<1x4xf32>
    %21 = vector.multi_reduction <add>, %20, %cst_14 [1] : vector<1x8x4xf32> to vector<1x4xf32>
    %22 = vector.shape_cast %21 : vector<1x4xf32> to vector<1x1x4xf32>
    %23 = vector.shape_cast %4 : vector<1x4xf32> to vector<1x1x4xf32>
    %24 = arith.addf %22, %23 : vector<1x1x4xf32>
    %cst_15 = arith.constant 0.000000e+00 : f32
    %25 = vector.broadcast %cst_15 : f32 to vector<1x1x4xf32>
    %26 = arith.maximumf %24, %25 : vector<1x1x4xf32>
    %27 = vector.shape_cast %5 : vector<8x4xf32> to vector<1x8x4xf32>
    %28 = vector.broadcast %26 : vector<1x1x4xf32> to vector<1x8x4xf32>
    %29 = arith.mulf %28, %27 : vector<1x8x4xf32>
    %cst_16 = arith.constant dense<0.000000e+00> : vector<1x8xf32>
    %30 = vector.multi_reduction <add>, %29, %cst_16 [2] : vector<1x8x4xf32> to vector<1x8xf32>
    %31 = vector.shape_cast %30 : vector<1x8xf32> to vector<1x8x1xf32>
    %32 = vector.shape_cast %6 : vector<8x1xf32> to vector<1x8x1xf32>
    %33 = arith.addf %31, %32 : vector<1x8x1xf32>
    %34 = arith.negf %33 : vector<1x8x1xf32>
    %35 = math.exp %34 : vector<1x8x1xf32>
    %cst_17 = arith.constant 1.000000e+00 : f32
    %36 = vector.broadcast %cst_17 : f32 to vector<1x8x1xf32>
    %37 = arith.addf %36, %35 : vector<1x8x1xf32>
    %38 = arith.divf %36, %37 : vector<1x8x1xf32>
    %39 = vector.broadcast %38 : vector<1x8x1xf32> to vector<1x8x256xf32>
    %40 = arith.mulf %0, %39 : vector<1x8x256xf32>
    %41 = vector.shape_cast %2 : vector<8x256xf32> to vector<1x8x256xf32>
    %42 = arith.mulf %40, %41 : vector<1x8x256xf32>
    %cst_18 = arith.constant 0.000000e+00 : f32
    %43 = vector.broadcast %cst_18 : f32 to vector<1x8x256xf32>
    %44 = arith.cmpf ogt, %42, %43 : vector<1x8x256xf32>
    %cst_19 = arith.constant 0.00999999977 : f32
    %45 = vector.broadcast %cst_19 : f32 to vector<1x8x256xf32>
    %46 = arith.mulf %45, %42 : vector<1x8x256xf32>
    %47 = arith.select %44, %42, %46 : vector<1x8x256xi1>, vector<1x8x256xf32>
    %cst_20 = arith.constant dense<0.000000e+00> : vector<1x256xf32>
    %48 = vector.multi_reduction <add>, %47, %cst_20 [1] : vector<1x8x256xf32> to vector<1x256xf32>
    %cst_21 = arith.constant 8.000000e+00 : f32
    %49 = vector.broadcast %cst_21 : f32 to vector<1x256xf32>
    %50 = arith.divf %48, %49 : vector<1x256xf32>
    %cst_22 = arith.constant dense<0xFF800000> : vector<1x256xf32>
    %51 = vector.multi_reduction <maximumf>, %47, %cst_22 [1] : vector<1x8x256xf32> to vector<1x256xf32>
    %52 = tpu.concatenate %50, %51 in 0 : vector<1x256xf32>, vector<1x256xf32> -> vector<2x256xf32>
    %cst_23 = arith.constant 0.000000e+00 : f32
    %53 = vector.broadcast %cst_23 : f32 to vector<2x256xf32>
    %c0_24 = arith.constant 0 : index
    %c0_25 = arith.constant 0 : index
    %c0_26 = arith.constant 0 : index
    %54 = vector.load %arg5[%c0_24, %c0_25, %c0_26] : memref<4x2x256xf32, #tpu.memory_space<vmem>>, vector<1x2x256xf32>
    %55 = vector.shape_cast %54 : vector<1x2x256xf32> to vector<2x256xf32>
    %56 = arith.mulf %52, %55 : vector<2x256xf32>
    %57 = arith.addf %53, %56 : vector<2x256xf32>
    %c255_i32 = arith.constant 255 : i32
    %58 = tpu.dynamic_rotate %52 by %c255_i32 dim 1 : vector<2x256xf32>, i32 -> vector<2x256xf32>
    %c1 = arith.constant 1 : index
    %c0_27 = arith.constant 0 : index
    %c0_28 = arith.constant 0 : index
    %59 = vector.load %arg5[%c1, %c0_27, %c0_28] : memref<4x2x256xf32, #tpu.memory_space<vmem>>, vector<1x2x256xf32>
    %60 = vector.shape_cast %59 : vector<1x2x256xf32> to vector<2x256xf32>
    %61 = arith.mulf %58, %60 : vector<2x256xf32>
    %62 = arith.addf %57, %61 : vector<2x256xf32>
    %c240_i32 = arith.constant 240 : i32
    %63 = tpu.dynamic_rotate %52 by %c240_i32 dim 1 : vector<2x256xf32>, i32 -> vector<2x256xf32>
    %c2 = arith.constant 2 : index
    %c0_29 = arith.constant 0 : index
    %c0_30 = arith.constant 0 : index
    %64 = vector.load %arg5[%c2, %c0_29, %c0_30] : memref<4x2x256xf32, #tpu.memory_space<vmem>>, vector<1x2x256xf32>
    %65 = vector.shape_cast %64 : vector<1x2x256xf32> to vector<2x256xf32>
    %66 = arith.mulf %63, %65 : vector<2x256xf32>
    %67 = arith.addf %62, %66 : vector<2x256xf32>
    %c239_i32 = arith.constant 239 : i32
    %68 = tpu.dynamic_rotate %52 by %c239_i32 dim 1 : vector<2x256xf32>, i32 -> vector<2x256xf32>
    %c3 = arith.constant 3 : index
    %c0_31 = arith.constant 0 : index
    %c0_32 = arith.constant 0 : index
    %69 = vector.load %arg5[%c3, %c0_31, %c0_32] : memref<4x2x256xf32, #tpu.memory_space<vmem>>, vector<1x2x256xf32>
    %70 = vector.shape_cast %69 : vector<1x2x256xf32> to vector<2x256xf32>
    %71 = arith.mulf %68, %70 : vector<2x256xf32>
    %72 = arith.addf %67, %71 : vector<2x256xf32>
    %73 = vector.extract_strided_slice %72 {offsets = [0, 0], sizes = [1, 256], strides = [1, 1]} : vector<2x256xf32> to vector<1x256xf32>
    %74 = vector.extract_strided_slice %72 {offsets = [1, 0], sizes = [1, 256], strides = [1, 1]} : vector<2x256xf32> to vector<1x256xf32>
    %75 = arith.addf %73, %74 : vector<1x256xf32>
    %76 = arith.negf %75 : vector<1x256xf32>
    %77 = math.exp %76 : vector<1x256xf32>
    %cst_33 = arith.constant 1.000000e+00 : f32
    %78 = vector.broadcast %cst_33 : f32 to vector<1x256xf32>
    %79 = arith.addf %78, %77 : vector<1x256xf32>
    %80 = arith.divf %78, %79 : vector<1x256xf32>
    %81 = vector.shape_cast %80 : vector<1x256xf32> to vector<1x1x256xf32>
    %82 = vector.broadcast %81 : vector<1x1x256xf32> to vector<1x8x256xf32>
    %83 = arith.mulf %40, %82 : vector<1x8x256xf32>
    %c0_34 = arith.constant 0 : index
    %c0_35 = arith.constant 0 : index
    %c0_36 = arith.constant 0 : index
    %84 = vector.load %arg6[%c0_34, %c0_35, %c0_36] : memref<1x8x256xf32, #tpu.memory_space<vmem>>, vector<1x8x256xf32>
    tpu.vector_store %arg6[%c0_34, %c0_35, %c0_36], %83 {strides = array<i32>} : memref<1x8x256xf32, #tpu.memory_space<vmem>>, vector<1x8x256xf32>,
    return
  }
  func.func @transform_0(%arg0: i32) -> (i32, i32, i32) {
    %c0_i32 = arith.constant 0 : i32
    %c0_i32_0 = arith.constant 0 : i32
    %c0_i32_1 = arith.constant 0 : i32
    return %arg0, %c0_i32, %c0_i32_0 : i32, i32, i32
  }
  func.func @transform_1(%arg0: i32) -> (i32, i32) {
    %c0_i32 = arith.constant 0 : i32
    %c0_i32_0 = arith.constant 0 : i32
    %c0_i32_1 = arith.constant 0 : i32
    return %c0_i32, %c0_i32_0 : i32, i32
  }
  func.func @transform_2(%arg0: i32) -> (i32, i32) {
    %c0_i32 = arith.constant 0 : i32
    %c0_i32_0 = arith.constant 0 : i32
    %c0_i32_1 = arith.constant 0 : i32
    return %c0_i32, %c0_i32_0 : i32, i32
  }
  func.func @transform_3(%arg0: i32) -> (i32, i32) {
    %c0_i32 = arith.constant 0 : i32
    %c0_i32_0 = arith.constant 0 : i32
    %c0_i32_1 = arith.constant 0 : i32
    return %c0_i32, %c0_i32_0 : i32, i32
  }
  func.func @transform_4(%arg0: i32) -> (i32, i32, i32) {
    %c0_i32 = arith.constant 0 : i32
    %c0_i32_0 = arith.constant 0 : i32
    %c0_i32_1 = arith.constant 0 : i32
    %c0_i32_2 = arith.constant 0 : i32
    return %c0_i32, %c0_i32_0, %c0_i32_1 : i32, i32, i32
  }
  func.func @transform_5(%arg0: i32) -> (i32, i32, i32) {
    %c0_i32 = arith.constant 0 : i32
    %c0_i32_0 = arith.constant 0 : i32
    %c0_i32_1 = arith.constant 0 : i32
    return %arg0, %c0_i32, %c0_i32_0 : i32, i32, i32
  }
}

</mosaic_0001>

<bundles_post_ra>
// kernel: tpu_custom_call.1
= control target key start
LH: loop header
LB: loop body
LE: loop exit
PB: predicated region body
PF: predicated region fallthrough
CT: control target
= control target key end

     0   :  { %10 = vsyncpa [#allocation3], 0  ;;  %s1044_s0 = inlined_call_operand.vmem [shape: f32[2,8,256], index: 0, kind: input, shape index: {}]   ;;  %s1045_s1 = inlined_call_operand.hbm [shape: f32[8,256], index: 1, kind: input, shape index: {}]   ;;  %s1046_s2 = inlined_call_operand.hbm [shape: f32[8,256], index: 2, kind: input, shape index: {}]   ;;  %s1047_s3 = inlined_call_operand.vmem [shape: f32[32,4], index: 3, kind: input, shape index: {}]   ;;  %s1048_s4 = inlined_call_operand.vmem [shape: f32[4,2,256], index: 4, kind: input, shape index: {}]   ;;  %s1049_s5 = inlined_call_operand.hbm [shape: f32[2,8,256], index: 5, kind: output, shape index: {}]  }
   0x1   :  { %11 = vsyncpa [#allocation6], 0 }
   0x2   :  { %12 = vsyncpa [#allocation4], 0 }
   0x3   :  { %14 = vsyncpa [#allocation4 + $0x1], 0  ;;  %s831_s18 = smov 0   ;;  %s833_s19 = smov 0  }
   0x4   :  { %s835_s20 = smov 0   ;;  %s837_s21 = smov 0  }
   0x5 LB: > { %s852_s22 = sadd.s32 4294967295, %s792_s21   ;;  %s560_s23 = sadd.s32 4294967294, %s792_s21   ;;  %s792_s21 = sphi %s837_s21, %s1067_s21   ;;  %s788_s20 = sphi %s835_s20, %s1066_s20   ;;  %s784_s19 = sphi %s833_s19, %s1065_s19   ;;  %s780_s18 = sphi %s831_s18, %s1064_s18  }
   0x6   : > { %s856_s24 = sadd.s32 1, %s792_s21   ;;  %s137_s25 = sadd.s32 1, %s788_s20 }
   0x7   : > { %s134_s26 = ssub.s32 %s792_s21, %s856_s24  ;;  %p147_p0 = scmp.ne.s32.totalorder %s788_s20, %s784_s19 }
   0x8   : > { %p135_p1 = scmp.eq.s32.totalorder %s134_s26, 0  ;;  %p148_p2 = scmp.eq.s32.totalorder %s852_s22, 1 }
   0x9   : > { %p153_p3 = scmp.ne.s32.totalorder %s784_s19, %s780_s18  ;;  %p154_p4 = scmp.eq.s32.totalorder %s560_s23, 1 }
   0xa   : > { %s867_s27 = scalar_select %p135_p1, %s788_s20, %s137_s25  }
   0xb   : > { %p869_p5 = por %p148_p2, %p147_p0  ;;  %p873_p6 = por %p154_p4, %p153_p3 }
   0xc   : > { %p561_p7 = scmp.ge.s32.totalorder %s792_s21, 1  ;;  %p161_p8 = scmp.lt.s32.totalorder %s792_s21, 3 }
   0xd   : > { %s1053_s28 = scalar_select %p869_p5, 1, 0 }
   0xe   : > { %s1054_s29 = scalar_select %p873_p6, 1, 0 }
   0xf   : > { %p1050_p9 = scmp.eq.s32.totalorder %s852_s22, 0  ;;  %p880_p10 = pnand %p561_p7, %p161_p8 }
  0x10   : > { %s794_s6 = smov [#allocation2]   ;;  %s795_s8 = smov [#allocation5]  }
  0x11   : > { %s1055_s30 = scalar_select %p880_p10, 1, 0 }
  0x12   : > { %s174_s7 = sshll.u32 %s794_s6, 4  ;;  %p598_p11 = pneg %p880_p10  ;;  %s175_s7 = int_to_ptr.vmem [resolvable:$true] %s174_s7 }
  0x13   : > { %s185_s9 = sshll.u32 %s795_s8, 4  ;;  %s666_s13 = scalar_lea.hbm %s1045_s1, 256  ;;  %s892_s9 = int_to_ptr.vmem [resolvable:$true] %s185_s9 }
  0x14   : > { %p888_p12 = pnand %p1050_p9, %p598_p11  ;;  %p667_p13 = scmp.ne.s32.totalorder %s1045_s1, %s666_s13 }
  0x15   : > { %p673_p3 = scmp.lt.u32.totalorder %s666_s13, %s1045_s1 }
  0x16   : > { %p668_p0 = pneg %p888_p12 }
  0x18   : > { %p669_p1 = pnand %p668_p0, %p667_p13 }
  0x1a   : > { %p670_p2 = pneg %p669_p1 }
  0x1c   : > { %p675_p4 = pnand %p673_p3, %p670_p2 }
  0x1e   : > { %678 = shalt.err (!%p675_p4)
}
  0x1f   : > { %s679_s23 = scalar_lea.vmem %s175_s7, 256  ;;  %p687_p9 = scmp.lt.s32.totalorder %s175_s7, %s175_s7 }
  0x20   : > { %p680_p7 = scmp.ne.s32.totalorder %s175_s7, %s679_s23  ;;  %p688_p6 = scmp.lt.s32.totalorder %s679_s23, %s679_s23 }
  0x22   : > { %p682_p8 = pnand %p680_p7, %p668_p0  ;;  %p689_p5 = por %p688_p6, %p687_p9 }
  0x24   : > { %p683_p11 = pneg %p682_p8 }
  0x26   : > { %p690_p10 = pnand %p689_p5, %p683_p11 }
  0x28   : > { %693 = shalt.err (!%p690_p10)
}
  0x29   : > { %601 = dma.hbm_to_vmem [thread:$0]  (!%p888_p12), %s1045_s1, 256, %s175_s7, [#allocation3]  }
  0x2a   : > { %s694_s11 = scalar_lea.hbm %s1046_s2, 256 }
  0x2b   : > { %p695_p13 = scmp.ne.s32.totalorder %s1046_s2, %s694_s11  ;;  %p701_p9 = scmp.lt.u32.totalorder %s694_s11, %s1046_s2 }
  0x2d   : > { %p697_p6 = pnand %p695_p13, %p668_p0 }
  0x2f   : > { %p698_p5 = pneg %p697_p6 }
  0x31   : > { %p703_p10 = pnand %p701_p9, %p698_p5 }
  0x33   : > { %706 = shalt.err (!%p703_p10)
}
  0x34   : > { %s707_s7 = scalar_lea.vmem %s892_s9, 256  ;;  %p715_p4 = scmp.lt.s32.totalorder %s892_s9, %s892_s9 }
  0x35   : > { %p708_p1 = scmp.ne.s32.totalorder %s892_s9, %s707_s7  ;;  %p716_p7 = scmp.lt.s32.totalorder %s707_s7, %s707_s7 }
  0x37   : > { %p710_p2 = pnand %p708_p1, %p668_p0  ;;  %p717_p8 = por %p716_p7, %p715_p4 }
  0x39   : > { %p711_p3 = pneg %p710_p2 }
  0x3b   : > { %p718_p11 = pnand %p717_p8, %p711_p3 }
  0x3d   : > { %721 = shalt.err (!%p718_p11)
}
  0x3e   : > { %604 = dma.hbm_to_vmem [thread:$0]  (!%p888_p12), %s1046_s2, 256, %s892_s9, [#allocation6]  }
  0x3f   : > { %p1057_p13 = scmp.ne.s32.totalorder %s1055_s30, 0 }
  0x40   : > { %p1058_p6 = scmp.eq.s32.totalorder (!%p1057_p13), %s852_s22, 0 }
  0x41   : > { %212 = sbr.rel (%p1057_p13) target bundleno = 764 (0x2fc), region = 40 }
  0x48   : > { %767 = dma.done.wait (%p1058_p6), [#allocation3], 256   ;;  %p1059_p0 = pmov %p1058_p6 }
  0x4a   : > { %769 = vsyncadd (%p1059_p0), [#allocation3], 4294967040  ;;  %p1060_p5 = pmov %p1059_p0 }
  0x4b   : > { %p1061_p9 = pmov %p1059_p0 }
  0x4c   : > { %771 = dma.done.wait (%p1060_p5), [#allocation6], 256  }
  0x4d   : > { %773 = vsyncadd (%p1061_p9), [#allocation6], 4294967040  ;;  %p244_p10 = scmp.lt.s32.totalorder %s852_s22, 1  ;;  %v251_v2 = vld [vmem:[#allocation2] sm:$0xff]  ;;  %v252_v3 = vld [vmem:[#allocation2 + $0x8] sm:$0xff]  ;;  %vm272_vm2 = vcmask 31744   ;;  %v282_v19 = vlaneseq }
  0x4e   : > { %v255_v11 = vld [vmem:[%s1047_s3] sm:$0xff]  ;;  %v256_v23 = vld [vmem:[%s1047_s3 + $0x8] sm:$0x1]  ;;  %v257_v28 = vld [vmem:[%s1047_s3 + $0x10] sm:$0xff]  ;;  %v796_v32 = vmov 0   ;;  %vm339_vm5 = vcmask 1040384  }
  0x4f   : > { %s245_s10 = scalar_select %p244_p10, %s852_s22, 1  ;;  %v283_v22 = vshrl.u32 %v282_v19, 7  ;;  %652 = vset.pattern.permute.xlu1 %v796_v32  ;;  %653 = vset.pattern.permute.xlu0 %v796_v32  ;;  %v258_v33 = vld [vmem:[%s1047_s3 + $0x18] sm:$0xff]  ;;  %v253_v40 = vld [vmem:[#allocation5] sm:$0xff] }
  0x50   : > { %v254_v41 = vld [vmem:[#allocation5 + $0x8] sm:$0xff]  ;;  %s797_s7 = smov 127   ;;  %s798_s16 = smov 112  }
  0x51   : > { %s586_s9 = sshll.u32 %s245_s10, 4  ;;  %v964_v26 = vsub.s32 0, %v283_v22  ;;  %s799_s17 = smov 111  }
  0x52   : > { %s248_s25 = scalar_lea.vmem %s1044_s0, %s586_s9  ;;  %s241_s11 = sand.u32 1, %s784_s19  }
  0x53   : > { %v249_v0 = vld [vmem:[%s248_s25] sm:$0xff]  ;;  %v250_v1 = vld [vmem:[%s248_s25 + $0x8] sm:$0xff]  ;;  %s568_s12 = sshll.u32 %s241_s11, 4  ;;  %s587_s13 = sshll.u32 %s852_s22, 8 }
  0x54   : > { %v259_v4 = vmul.f32 %v251_v2, %v249_v0  ;;  %v260_v5 = vmul.f32 %v252_v3, %v250_v1  ;;  %s243_s14 = scalar_lea.vmem [#allocation7], %s568_s12  ;;  %s465_s22 = scalar_lea.sflag [#allocation4], %s241_s11 }
  0x55   : > { %s479_s15 = sshll.u32 %s243_s14, 4  ;;  %p1062_p1 = scmp.ne.s32.totalorder %s1053_s28, 0  ;;  %s1004_s15 = int_to_ptr.vmem [resolvable:$true] %s479_s15 }
  0x56   : > { %vm261_vm0 = vcmp.gt.f32.partialorder %v259_v4, 0.0  ;;  %v263_v6 = vmul.f32 0.01, %v259_v4  ;;  %vm262_vm1 = vcmp.gt.f32.partialorder %v260_v5, 0.0  ;;  %v264_v7 = vmul.f32 0.01, %v260_v5 }
  0x57   : > { %s722_s10 = scalar_lea.vmem %s1004_s15, 256  ;;  %s800_s9 = smov [#allocation7]  }
  0x58   : > { %v265_v8 = vsel %vm261_vm0, %v259_v4, %v263_v6  ;;  %v266_v9 = vsel %vm262_vm1, %v260_v5, %v264_v7  ;;  %p723_p12 = scmp.ne.s32.totalorder %s1004_s15, %s722_s10  ;;  %s726_s23 = sshll.u32 %s800_s9, 4  ;;  %s727_s23 = int_to_ptr.vmem [resolvable:$false] %s726_s23 }
  0x59   : > { %v267_v10 = vadd.f32 %v266_v9, %v265_v8  ;;  %s728_s30 = scalar_lea.vmem %s727_s23, 512  ;;  %p729_p4 = scmp.lt.s32.totalorder %s1004_s15, %s727_s23 }
  0x5a   : > { %p724_p2 = pnand %p723_p12, %p1062_p1  ;;  %p730_p7 = scmp.lt.s32.totalorder %s728_s30, %s722_s10 }
  0x5b   : > { %268 = vadd.xlane.f32.xlu0 %v267_v10 }
  0x5c   : > { %p725_p3 = pneg %p724_p2  ;;  %p731_p8 = por %p730_p7, %p729_p4 }
  0x5e   : > { %p732_p11 = pnand %p731_p8, %p725_p3 }
  0xe8   : > { %v269_v12 = vpop.xlane.xlu0 %268 }
  0xe9   : > { %v270_v13 = vmul.f32 0.0078125, %v269_v12 }
  0xeb   : > { %v271_v14 = vmul.f32 %v270_v13, %v255_v11 }
  0xed   : > { %v273_v15 = vsel %vm272_vm2, %v271_v14, 0.0  ;;  %v363_v14 = vand.u32 127, %v282_v19 }
  0xee   : > { %v274_v16 = vrot.slane %v273_v15, 4 }
  0xef   : > { %vm364_vm6 = vcmp.lt.s32.totalorder %v363_v14, 127  ;;  %vm388_vm7 = vcmp.lt.s32.totalorder %v363_v14, 112  ;;  %vm412_vm8 = vcmp.lt.s32.totalorder %v363_v14, 111 }
  0xf0   : > { %v275_v17 = vadd.f32 %v274_v16, %v273_v15  ;;  %v574_v16 = vld.sshfl [vmem:[%s1048_s4 + $0x4] sm:$0x33 pattern:$0x76325410] }
  0xf2   : > { %v276_v18 = vrot.slane %v275_v17, 2 }
  0xf4   : > { %v277_v20 = vadd.f32 %v276_v18, %v275_v17  ;;  %v572_v18 = vld.sshfl [vmem:[%s1048_s4] sm:$0x33 pattern:$0x76325410] }
  0xf6   : > { %v278_v21 = vrot.slane %v277_v20, 1 }
  0xf8   : > { %v279_v24 = vadd.f32 %v278_v21, %v277_v20  ;;  %v576_v20 = vld.sshfl [vmem:[%s1048_s4 + $0x8] sm:$0x33 pattern:$0x76325410]  ;;  %v377_v21 = vcombine.high %v574_v16, %v574_v16 }
  0xfa   : > { %v280_v25 = vadd.f32 %v279_v24, %v256_v23  ;;  %v351_v24 = vcombine.high %v572_v18, %v572_v18 }
  0xfc   : > { %v281_v27 = vmax.f32 %v280_v25, 0.0  ;;  %v401_v25 = vcombine.high %v576_v20, %v576_v20 }
  0xfe   : > { %v285_v29 = vrot.slane %v281_v27, %v964_v26  ;;  %v578_v27 = vld.sshfl [vmem:[%s1048_s4 + $0xc] sm:$0x33 pattern:$0x76325410] }
 0x100   : > { %v286_v30 = vmul.f32 %v285_v29, %v257_v28 }
 0x102   : > { %v287_v31 = vsel %vm272_vm2, %v286_v30, 0.0 }
 0x103   : > { %288 = vadd.xlane.f32.xlu0 %v287_v31 }
 0x190   : > { %v289_v34 = vpop.xlane.xlu0 %288 }
 0x191   : > { %v290_v35 = vadd.f32 %v289_v34, %v258_v33  ;;  %v425_v33 = vcombine.high %v578_v27, %v578_v27 }
 0x193   : > { %v571_v36 = vmul.f32 -1.442695, %v290_v35 }
 0x195   : > { %654 = vpow2.f32 %v571_v36 }
 0x19f   : > { %v655_v37 = vpop.eup %654 }
 0x1a0   : > { %v294_v38 = vadd.f32 1.0, %v655_v37 }
 0x1a2   : > { %656 = vrcp.f32 %v294_v38 }
 0x1ac   : > { %v657_v39 = vpop.eup %656 }
 0x1ad   : > { %299 = vperm.xlu1 %652, %v657_v39  }
 0x22c   : > { %v300_v42 = vpop.permute.xlu1 %299 }
 0x22d   : > { %v974_v43 = vmul.f32 %v300_v42, %v249_v0  ;;  %v976_v44 = vmul.f32 %v300_v42, %v250_v1 }
 0x22f   : > { %v304_v45 = vmul.f32 %v974_v43, %v253_v40  ;;  %v305_v46 = vmul.f32 %v976_v44, %v254_v41 }
 0x231   : > { %vm306_vm3 = vcmp.gt.f32.partialorder %v304_v45, 0.0  ;;  %vm307_vm4 = vcmp.gt.f32.partialorder %v305_v46, 0.0  ;;  %v308_v47 = vmul.f32 0.01, %v304_v45  ;;  %v309_v48 = vmul.f32 0.01, %v305_v46 }
 0x233   : > { %v310_v49 = vsel %vm306_vm3, %v304_v45, %v308_v47  ;;  %v311_v50 = vsel %vm307_vm4, %v305_v46, %v309_v48 }
 0x234   : > { %v312_v51 = vrot.slane %v310_v49, 4  ;;  %v318_v52 = vrot.slane %v311_v50, 4 }
 0x236   : > { %v313_v53 = vadd.f32 %v312_v51, %v310_v49  ;;  %v319_v54 = vadd.f32 %v318_v52, %v311_v50  ;;  %v328_v55 = vmax.f32 %v310_v49, %v312_v51  ;;  %v334_v56 = vmax.f32 %v311_v50, %v318_v52 }
 0x238   : > { %v320_v57 = vrot.slane %v319_v54, 2  ;;  %v335_v58 = vrot.slane %v334_v56, 2  ;;  %v314_v59 = vrot.slane %v313_v53, 2  ;;  %v329_v60 = vrot.slane %v328_v55, 2 }
 0x23a   : > { %v321_v61 = vadd.f32 %v320_v57, %v319_v54  ;;  %v336_v62 = vmax.f32 %v334_v56, %v335_v58  ;;  %v315_v63 = vadd.f32 %v314_v59, %v313_v53  ;;  %v330_v0 = vmax.f32 %v328_v55, %v329_v60 }
 0x23c   : > { %v322_v1 = vrot.slane %v321_v61, 1  ;;  %v337_v2 = vrot.slane %v336_v62, 1  ;;  %v316_v3 = vrot.slane %v315_v63, 1  ;;  %v331_v4 = vrot.slane %v330_v0, 1 }
 0x23e   : > { %v323_v5 = vadd.f32 %v322_v1, %v321_v61  ;;  %v317_v6 = vadd.f32 %v316_v3, %v315_v63  ;;  %v338_v8 = vmax.f32 %v336_v62, %v337_v2  ;;  %v332_v10 = vmax.f32 %v330_v0, %v331_v4 }
 0x240   : > { %v326_v7 = vmul.f32 0.125, %v323_v5  ;;  %v325_v9 = vmul.f32 0.125, %v317_v6 }
 0x242   : > { %v341_v11 = vsel %vm339_vm5, %v326_v7, %v338_v8  ;;  %v340_v12 = vsel %vm339_vm5, %v325_v9, %v332_v10 }
 0x243   : > { %360 = vrot.lane.b32.xlu0 %v341_v11, %s797_s7  ;;  %358 = vrot.lane.b32.xlu1 %v340_v12, %s797_s7  ;;  %v355_v34 = vmul.f32 %v351_v24, %v341_v11  ;;  %v354_v35 = vmul.f32 %v572_v18, %v340_v12 }
 0x247   : > { %384 = vrot.lane.b32.xlu1 %v340_v12, %s798_s16 }
 0x24b   : > { %386 = vrot.lane.b32.xlu1 %v341_v11, %s798_s16 }
 0x24f   : > { %408 = vrot.lane.b32.xlu1 %v340_v12, %s799_s17 }
 0x253   : > { %410 = vrot.lane.b32.xlu1 %v341_v11, %s799_s17  ;;  %s1002_s17 = scalar_lea.hbm %s1049_s5, %s587_s13 }
 0x2b5   : > { %v359_v13 = vpop.permute.xlu1 %358  ;;  %v361_v17 = vpop.permute.xlu0 %360 }
 0x2b6   : > { %v365_v23 = vsel %vm364_vm6, %v359_v13, %v361_v17  ;;  %v366_v19 = vsel %vm364_vm6, %v361_v17, %v359_v13 }
 0x2b7   : > { %v380_v30 = vmul.f32 %v574_v16, %v365_v23  ;;  %v381_v31 = vmul.f32 %v377_v21, %v366_v19 }
 0x2b9   : > { %v385_v15 = vpop.permute.xlu1 %384  ;;  %v382_v38 = vadd.f32 %v380_v30, %v354_v35  ;;  %v383_v39 = vadd.f32 %v381_v31, %v355_v34 }
 0x2bd   : > { %v387_v22 = vpop.permute.xlu1 %386 }
 0x2be   : > { %v389_v28 = vsel %vm388_vm7, %v385_v15, %v387_v22  ;;  %v390_v29 = vsel %vm388_vm7, %v387_v22, %v385_v15 }
 0x2bf   : > { %v404_v36 = vmul.f32 %v576_v20, %v389_v28  ;;  %v405_v37 = vmul.f32 %v401_v25, %v390_v29 }
 0x2c1   : > { %v409_v32 = vpop.permute.xlu1 %408  ;;  %v406_v45 = vadd.f32 %v404_v36, %v382_v38  ;;  %v407_v46 = vadd.f32 %v405_v37, %v383_v39 }
 0x2c5   : > { %v411_v40 = vpop.permute.xlu1 %410 }
 0x2c6   : > { %v413_v41 = vsel %vm412_vm8, %v409_v32, %v411_v40  ;;  %v414_v42 = vsel %vm412_vm8, %v411_v40, %v409_v32 }
 0x2c7   : > { %v428_v47 = vmul.f32 %v578_v27, %v413_v41  ;;  %v429_v48 = vmul.f32 %v425_v33, %v414_v42 }
 0x2c9   : > { %v430_v49 = vadd.f32 %v428_v47, %v406_v45  ;;  %v431_v50 = vadd.f32 %v429_v48, %v407_v46 }
 0x2cb   : > { %v434_v51 = vrot.slane %v430_v49, 1  ;;  %v435_v52 = vrot.slane %v431_v50, 1 }
 0x2cd   : > { %v438_v53 = vadd.f32 %v434_v51, %v430_v49  ;;  %v439_v54 = vadd.f32 %v435_v52, %v431_v50 }
 0x2cf   : > { %v579_v55 = vmul.f32 -1.442695, %v438_v53  ;;  %v580_v56 = vmul.f32 -1.442695, %v439_v54 }
 0x2d1   : > { %658 = vpow2.f32 %v579_v55 }
 0x2d2   : > { %660 = vpow2.f32 %v580_v56 }
 0x2db   : > { %v659_v57 = vpop.eup %658 }
 0x2dc   : > { %v661_v58 = vpop.eup %660  ;;  %v446_v59 = vadd.f32 1.0, %v659_v57 }
 0x2dd   : > { %v447_v60 = vadd.f32 1.0, %v661_v58 }
 0x2de   : > { %662 = vrcp.f32 %v446_v59 }
 0x2df   : > { %664 = vrcp.f32 %v447_v60 }
 0x2e8   : > { %v663_v61 = vpop.eup %662 }
 0x2e9   : > { %v665_v62 = vpop.eup %664  ;;  %v455_v63 = vrot.slane %v663_v61, %v964_v26 }
 0x2ea   : > { %v459_v0 = vrot.slane %v665_v62, %v964_v26 }
 0x2eb   : > { %v460_v1 = vmul.f32 %v455_v63, %v974_v43 }
 0x2ec   : > { %v461_v2 = vmul.f32 %v459_v0, %v976_v44 }
 0x2ed   : > { %462 = vst [vmem:[%s243_s14] sm:$0xff] %v460_v1 }
 0x2ee   : > { %463 = vst [vmem:[%s243_s14 + $0x8] sm:$0xff] %v461_v2 }
 0x2ef   : > { %735 = shalt.err (!%p732_p11)
}
 0x2f0   : > { %s736_s25 = scalar_lea.hbm %s1002_s17, 256  ;;  %s740_s8 = scalar_lea.hbm %s1049_s5, 512 }
 0x2f1   : > { %p737_p13 = scmp.ne.s32.totalorder %s1002_s17, %s736_s25  ;;  %p741_p5 = scmp.lt.u32.totalorder %s1002_s17, %s1049_s5 }
 0x2f2   : > { %p742_p9 = scmp.lt.u32.totalorder %s740_s8, %s736_s25  ;;  %p744_p12 = scmp.lt.u32.totalorder %s736_s25, %s1002_s17 }
 0x2f3   : > { %p738_p6 = pnand %p737_p13, %p1062_p1 }
 0x2f4   : > { %p743_p10 = por %p742_p9, %p741_p5 }
 0x2f5   : > { %p739_p0 = pneg %p738_p6 }
 0x2f6   : > { %p745_p2 = por %p744_p12, %p743_p10 }
 0x2f8   : > { %p746_p3 = pnand %p745_p2, %p739_p0 }
 0x2fa   : > { %749 = shalt.err (!%p746_p3)
}
 0x2fb   : > { %596 = dma.vmem_to_hbm [thread:$0]  (%p1062_p1), %s1004_s15, 256, %s1002_s17, %s465_s22  }
 0x2fc PF: > { %p613_p4 = scmp.ge.s32.totalorder %s792_s21, 2  ;;  %s491_s13 = sand.u32 1, %s780_s18  }
 0x2fd   : > { %p1063_p7 = scmp.ne.s32.totalorder %s1054_s29, 0  ;;  %s492_s14 = scalar_lea.sflag [#allocation4], %s491_s13 }
 0x2ff   : > { %p606_p8 = pnand %p613_p4, %p1063_p7 }
 0x301   : > { %775 = dma.done.wait (!%p606_p8), %s492_s14, 256  }
 0x302   : > { %777 = vsyncadd (!%p606_p8), %s492_s14, 4294967040  ;;  %p17_p11 = scmp.ge.s32.totalorder %s856_s24, 4   ;;  %s1064_s18 = smov %s784_s19 }
 0x303   : > { %s1065_s19 = smov %s788_s20  ;;  %s1066_s20 = smov %s867_s27 }
 0x304   : > { %s1067_s21 = smov %s856_s24  ;;  %19 = sbr.rel (!%p17_p11) target bundleno = 5 (0x5), region = 87 }
 0x30b   :  { %497 = vsyncpa [#allocation3], 1 }
 0x30c   :  { %499 = vsyncpa [#allocation3 + $0x1], 1 }
 0x30d   :  { %500 = vsyncpa [#allocation6], 1 }
 0x30e   :  { %501 = vsyncpa [#allocation4], 1 }
 0x30f   :  { %503 = vsyncpa [#allocation4 + $0x1], 1 }

</bundles_post_ra>
